<compile_context>
chip_gen: v5e
topology: v5e:2x2
jax: 0.10.0
libtpu: 0.0.40
codegen_flags: <defaults>
</compile_context>

<pallas_src>
import functools
import math

import jax
import jax.numpy as jnp
from jax.experimental import pallas as pl
from jax.experimental.pallas import tpu as pltpu


def make_gaussian_weight(channels: int, kernel_size: int, sigma: float) -> jnp.ndarray:
    """Replicates GaussianSmoothing.__init__ weight construction (dim=1)."""
    x = jnp.arange(kernel_size, dtype=jnp.float32)
    mean = (kernel_size - 1) / 2.0
    kernel = (1.0 / (sigma * math.sqrt(2.0 * math.pi))) * jnp.exp(
        -(((x - mean) / sigma) ** 2) / 2.0
    )
    kernel = kernel / jnp.sum(kernel)
    # PyTorch: kernel.view(1,1,K).repeat(channels,1,1) -> (C,1,K); keep (C,K).
    return jnp.broadcast_to(kernel[None, :], (channels, kernel_size))


def _round_up(v: int, m: int) -> int:
    return ((v + m - 1) // m) * m


def _gauss_rows_kernel(taps_ref, x_ref, o_ref, *, kernel_size: int):
    # taps_ref: (K,)          f32 taps in SMEM (identical for every channel/row)
    # x_ref:    (TR, L_in)    row tile of the padded input in VMEM (incl. K-1 halo)
    # o_ref:    (TR, L_out_p) lane-dense (multiple-of-128) output block
    l_out = o_ref.shape[-1]
    x = x_ref[...].astype(jnp.float32)
    # k = 0 term initialises the accumulator (saves a zero-fill + add pass).
    acc = x[:, 0:l_out] * taps_ref[0]
    for kk in range(1, kernel_size):  # static unroll over the small kernel
        acc = acc + x[:, kk:kk + l_out] * taps_ref[kk]
    o_ref[...] = acc.astype(o_ref.dtype)


def gaussian_smoothing(x: jnp.ndarray, weight: jnp.ndarray) -> jnp.ndarray:
    """Depthwise 1-D Gaussian conv, valid padding.

    x:      (N, C, L)
    weight: (C, K) or (C, 1, K)  (GaussianSmoothing buffer: identical taps per channel)
    returns (N, C, L - K + 1)
    """
    n, c, l = x.shape
    if weight.ndim == 3:
        weight = weight[:, 0, :]
    cw, k = weight.shape
    assert cw == c
    l_out = l - k + 1
    assert l_out >= 1

    # GaussianSmoothing repeats the same kernel for all channels -> (K,) taps.
    taps = weight[0].astype(jnp.float32)

    # Collapse (N, C) into a single row axis.
    r = n * c
    x2 = x.reshape(r, l)

    # Lane-dense output: pad L_out to a multiple of 128; input needs a K-1 halo.
    l_out_pad = _round_up(l_out, 128)
    l_in_pad = l_out_pad + (k - 1)  # block last dim == full padded array dim

    # Row tile: multiple of 8, sized so a double-buffered (in + out) block stays
    # well under the smallest scoped-VMEM default (v5e: 16 MiB).
    itemsize = jnp.dtype(x.dtype).itemsize
    bytes_per_row = (l_in_pad + l_out_pad) * itemsize
    target_block_bytes = 2 * 1024 * 1024
    tr = min(
        1024,
        _round_up(r, 8),
        max(8, (target_block_bytes // max(bytes_per_row, 1)) // 8 * 8),
    )
    tr = max(8, tr)

    r_pad = _round_up(r, tr)
    x2p = jnp.pad(x2, ((0, r_pad - r), (0, l_in_pad - l)))

    kernel = functools.partial(_gauss_rows_kernel, kernel_size=k)

    out_pad = pl.pallas_call(
        kernel,
        out_shape=jax.ShapeDtypeStruct((r_pad, l_out_pad), x.dtype),
        grid_spec=pltpu.PrefetchScalarGridSpec(
            num_scalar_prefetch=0,
            grid=(r_pad // tr,),
            in_specs=[
                # (K,) taps resident in SMEM, scalar-indexed inside the kernel.
                pl.BlockSpec(memory_space=pltpu.MemorySpace.SMEM),
                # Row tile of the padded input (last dim == full array dim).
                pl.BlockSpec((tr, l_in_pad), lambda i: (i, 0)),
            ],
            out_specs=pl.BlockSpec((tr, l_out_pad), lambda i: (i, 0)),
        ),
        compiler_params=pltpu.CompilerParams(
            dimension_semantics=("parallel",),
        ),
    )(taps, x2p)

    # Strip row / lane padding and restore (N, C, L_out).
    return out_pad[:r, :l_out].reshape(n, c, l_out)


def _reference(x, weight, k):
    l_out = x.shape[-1] - k + 1
    ref = jnp.zeros(x.shape[:2] + (l_out,), jnp.float32)
    for kk in range(k):
        ref = ref + x[:, :, kk:kk + l_out] * weight[None, :, kk:kk + 1]
    return ref


if __name__ == "__main__":
    # Small shapes consistent with the module's forward (conv1d, NCL layout).
    N, C, L = 2, 4, 16
    KERNEL_SIZE, SIGMA = 5, 2.0

    key = jax.random.PRNGKey(0)
    x = jax.random.normal(key, (N, C, L), dtype=jnp.float32)
    weight = make_gaussian_weight(C, KERNEL_SIZE, SIGMA)  # deterministic init

    out = gaussian_smoothing(x, weight)
    out = jax.block_until_ready(out)

    l_out = L - KERNEL_SIZE + 1
    ref = _reference(x, weight, KERNEL_SIZE)
    assert out.shape == (N, C, l_out)
    assert jnp.allclose(out, ref, atol=1e-5, rtol=1e-5)

    # Second small case exercising row-padding (N*C not a multiple of 8).
    N2, C2, L2 = 1, 3, 20
    x2 = jax.random.normal(jax.random.PRNGKey(0), (N2, C2, L2), dtype=jnp.float32)
    w2 = make_gaussian_weight(C2, KERNEL_SIZE, SIGMA)
    out2 = jax.block_until_ready(gaussian_smoothing(x2, w2))
    ref2 = _reference(x2, w2, KERNEL_SIZE)
    assert out2.shape == (N2, C2, L2 - KERNEL_SIZE + 1)
    assert jnp.allclose(out2, ref2, atol=1e-5, rtol=1e-5)

    print("KERNEL_OK")
</pallas_src>

<mosaic_0001>
module attributes {stable_mosaic.version = 11 : i64} {
  func.func @_gauss_rows_kernel(%arg0: i32, %arg1: memref<5xf32, #tpu.memory_space<smem>>, %arg2: memref<8x132xf32, #tpu.memory_space<vmem>>, %arg3: memref<8x128xf32, #tpu.memory_space<vmem>>) attributes {dimension_semantics = [#tpu.dimension_semantics<parallel>], iteration_bounds = array<i64: 1>, scalar_prefetch = 0 : i64, scratch_operands = 0 : i64, tpu.core_type = #tpu.core_type<tc>, window_params = [{transform_indices = @transform_0, window_bounds = array<i64: 5>}, {transform_indices = @transform_1, window_bounds = array<i64: 8, 132>}, {transform_indices = @transform_2, window_bounds = array<i64: 8, 128>}]} {
    %c0 = arith.constant 0 : index
    %c0_0 = arith.constant 0 : index
    %0 = vector.load %arg2[%c0, %c0_0] : memref<8x132xf32, #tpu.memory_space<vmem>>, vector<8x132xf32>
    %1 = vector.extract_strided_slice %0 {offsets = [0, 0], sizes = [8, 128], strides = [1, 1]} : vector<8x132xf32> to vector<8x128xf32>
    %c0_1 = arith.constant 0 : index
    %2 = memref.load %arg1[%c0_1] : memref<5xf32, #tpu.memory_space<smem>>
    %3 = vector.broadcast %2 : f32 to vector<8x128xf32>
    %4 = arith.mulf %1, %3 : vector<8x128xf32>
    %5 = vector.extract_strided_slice %0 {offsets = [0, 1], sizes = [8, 128], strides = [1, 1]} : vector<8x132xf32> to vector<8x128xf32>
    %c1 = arith.constant 1 : index
    %6 = memref.load %arg1[%c1] : memref<5xf32, #tpu.memory_space<smem>>
    %7 = vector.broadcast %6 : f32 to vector<8x128xf32>
    %8 = arith.mulf %5, %7 : vector<8x128xf32>
    %9 = arith.addf %4, %8 : vector<8x128xf32>
    %10 = vector.extract_strided_slice %0 {offsets = [0, 2], sizes = [8, 128], strides = [1, 1]} : vector<8x132xf32> to vector<8x128xf32>
    %c2 = arith.constant 2 : index
    %11 = memref.load %arg1[%c2] : memref<5xf32, #tpu.memory_space<smem>>
    %12 = vector.broadcast %11 : f32 to vector<8x128xf32>
    %13 = arith.mulf %10, %12 : vector<8x128xf32>
    %14 = arith.addf %9, %13 : vector<8x128xf32>
    %15 = vector.extract_strided_slice %0 {offsets = [0, 3], sizes = [8, 128], strides = [1, 1]} : vector<8x132xf32> to vector<8x128xf32>
    %c3 = arith.constant 3 : index
    %16 = memref.load %arg1[%c3] : memref<5xf32, #tpu.memory_space<smem>>
    %17 = vector.broadcast %16 : f32 to vector<8x128xf32>
    %18 = arith.mulf %15, %17 : vector<8x128xf32>
    %19 = arith.addf %14, %18 : vector<8x128xf32>
    %20 = vector.extract_strided_slice %0 {offsets = [0, 4], sizes = [8, 128], strides = [1, 1]} : vector<8x132xf32> to vector<8x128xf32>
    %c4 = arith.constant 4 : index
    %21 = memref.load %arg1[%c4] : memref<5xf32, #tpu.memory_space<smem>>
    %22 = vector.broadcast %21 : f32 to vector<8x128xf32>
    %23 = arith.mulf %20, %22 : vector<8x128xf32>
    %24 = arith.addf %19, %23 : vector<8x128xf32>
    %c0_2 = arith.constant 0 : index
    %c0_3 = arith.constant 0 : index
    %25 = vector.load %arg3[%c0_2, %c0_3] : memref<8x128xf32, #tpu.memory_space<vmem>>, vector<8x128xf32>
    tpu.vector_store %arg3[%c0_2, %c0_3], %24 {strides = array<i32>} : memref<8x128xf32, #tpu.memory_space<vmem>>, vector<8x128xf32>,
    return
  }
  func.func @transform_0(%arg0: i32) -> i32 {
    %c0_i32 = arith.constant 0 : i32
    %c0_i32_0 = arith.constant 0 : i32
    return %c0_i32 : i32
  }
  func.func @transform_1(%arg0: i32) -> (i32, i32) {
    %c0_i32 = arith.constant 0 : i32
    %c0_i32_0 = arith.constant 0 : i32
    return %arg0, %c0_i32 : i32, i32
  }
  func.func @transform_2(%arg0: i32) -> (i32, i32) {
    %c0_i32 = arith.constant 0 : i32
    %c0_i32_0 = arith.constant 0 : i32
    return %arg0, %c0_i32 : i32, i32
  }
}

</mosaic_0001>

<bundles_post_ra>
// kernel: tpu_custom_call.1
= control target key start
LH: loop header
LB: loop body
LE: loop exit
PB: predicated region body
PF: predicated region fallthrough
CT: control target
= control target key end

     0   :  { %7 = vsyncpa [#allocation5], 0  ;;  %s227_s0 = inlined_call_operand.hbm [shape: f32[5], index: 0, kind: input, shape index: {}]   ;;  %s228_s1 = inlined_call_operand.hbm [shape: f32[8,132], index: 1, kind: input, shape index: {}]   ;;  %s229_s2 = inlined_call_operand.hbm [shape: f32[8,128], index: 2, kind: output, shape index: {}]  }
   0x1   :  { %8 = vsyncpa [#allocation3], 0 }
   0x2   :  { %9 = vsyncpa [#allocation4], 0  ;;  %s15_s11 = sshll.u32 %s227_s0, 4  ;;  %s24_s14 = sshll.u32 %s228_s1, 4  ;;  %s16_s11 = int_to_ptr.hbm [resolvable:$true] %s15_s11  ;;  %s25_s14 = int_to_ptr.hbm [resolvable:$true] %s24_s14 }
   0x3   :  { %s196_s15 = smov [#allocation2]   ;;  %s197_s16 = smov [#allocation6]  }
   0x4   :  { %18 = dma.hbm_to_smem %s16_s11, 16, %s196_s15, [#allocation5]  }
   0x5   :  { %s26_s17 = sshll.u32 %s197_s16, 4  ;;  %s27_s17 = int_to_ptr.vmem [resolvable:$true] %s26_s17 }
   0x6   :  { %29 = dma.hbm_to_vmem [thread:$0]  %s25_s14, 256, %s27_s17, [#allocation3]  }
   0x7   :  { %190 = dma.done.wait [#allocation5], 16  }
   0x8   :  { %191 = vsyncadd [#allocation5], 4294967280 }
   0x9   :  { %192 = dma.done.wait [#allocation3], 256  }
   0xa   :  { %193 = vsyncadd [#allocation3], 4294967040 }
   0xb   :  { %38 = sfence }
   0xc   :  { %s120_s18 = sld [smem:[#allocation2 + $0x2]]  ;;  %v39_v0 = vld [vmem:[#allocation6] sm:$0xff]  ;;  %s198_s1 = smov 126   ;;  %v40_v6 = vld [vmem:[#allocation6 + $0x8] sm:$0xff]  ;;  %vm54_vm0 = vcmask 1039360   ;;  %vm68_vm1 = vcmask 1031168  }
   0xd   :  { %s119_s19 = sld [smem:[#allocation2 + $0x1]]  ;;  %s199_s20 = smov 127   ;;  %vm82_vm2 = vcmask 1022976   ;;  %vm96_vm3 = vcmask 1014784  }
   0xe   :  { %s121_s0 = sld [smem:[#allocation2 + $0x3]]  ;;  %s200_s22 = smov 125  }
   0xf   :  { %s122_s21 = sld [smem:[#allocation2 + $0x4]]  ;;  %s201_s23 = smov 124  }
  0x10   :  { %s41_s24 = sld [smem:[#allocation2]]  ;;  %s202_s25 = smov [#allocation7]  }
  0x11   :  { %s106_s26 = sshll.u32 %s202_s25, 4  ;;  %s108_s29 = sshll.u32 %s229_s2, 4  ;;  %s107_s26 = int_to_ptr.vmem [resolvable:$true] %s106_s26  ;;  %s109_s29 = int_to_ptr.hbm [resolvable:$true] %s108_s29 }
  0x12   :  { %v59_v1 = vstv %s120_s18 }
  0x13   :  { %v60_v2 = vmul.f32 %v59_v1, %v39_v0  ;;  %v45_v3 = vstv %s119_s19  ;;  %v61_v8 = vmul.f32 %v59_v1, %v40_v6 }
  0x14   :  { %v46_v4 = vmul.f32 %v45_v3, %v39_v0  ;;  %v73_v5 = vstv %s121_s0  ;;  %v47_v9 = vmul.f32 %v45_v3, %v40_v6 }
  0x15   :  { %64 = vrot.lane.b32.xlu1 %v60_v2, %s198_s1  ;;  %v74_v7 = vmul.f32 %v73_v5, %v39_v0  ;;  %v75_v10 = vmul.f32 %v73_v5, %v40_v6  ;;  %v87_v11 = vstv %s122_s21 }
  0x16   :  { %50 = vrot.lane.b32.xlu0 %v46_v4, %s199_s20  ;;  %v89_v12 = vmul.f32 %v87_v11, %v40_v6  ;;  %v88_v13 = vmul.f32 %v87_v11, %v39_v0  ;;  %v42_v17 = vstv %s41_s24 }
  0x17   :  { %78 = vrot.lane.b32.xlu2 %v74_v7, %s200_s22  ;;  %v43_v18 = vmul.f32 %v42_v17, %v39_v0 }
  0x1d   :  { %66 = vrot.lane.b32.xlu1 %v61_v8, %s198_s1 }
  0x1e   :  { %52 = vrot.lane.b32.xlu0 %v47_v9, %s199_s20 }
  0x1f   :  { %80 = vrot.lane.b32.xlu2 %v75_v10, %s200_s22 }
  0x25   :  { %94 = vrot.lane.b32.xlu1 %v89_v12, %s201_s23 }
  0x26   :  { %92 = vrot.lane.b32.xlu0 %v88_v13, %s201_s23 }
  0x71   :  { %v79_v16 = vpop.permute.xlu2 %78 }
  0x79   :  { %v81_v24 = vpop.permute.xlu2 %80 }
  0x7a   :  { %v83_v26 = vsel %vm82_vm2, %v79_v16, %v81_v24 }
  0x87   :  { %v65_v14 = vpop.permute.xlu1 %64 }
  0x88   :  { %v51_v15 = vpop.permute.xlu0 %50 }
  0x8f   :  { %v67_v19 = vpop.permute.xlu1 %66 }
  0x90   :  { %v53_v20 = vpop.permute.xlu0 %52  ;;  %v69_v23 = vsel %vm68_vm1, %v65_v14, %v67_v19 }
  0x91   :  { %v55_v21 = vsel %vm54_vm0, %v51_v15, %v53_v20 }
  0x92   :  { %v57_v22 = vadd.f32 %v55_v21, %v43_v18 }
  0x94   :  { %v71_v25 = vadd.f32 %v69_v23, %v57_v22 }
  0x96   :  { %v85_v29 = vadd.f32 %v83_v26, %v71_v25 }
  0x97   :  { %v95_v27 = vpop.permute.xlu1 %94 }
  0x98   :  { %v93_v28 = vpop.permute.xlu0 %92 }
  0x99   :  { %v97_v30 = vsel %vm96_vm3, %v93_v28, %v95_v27 }
  0x9a   :  { %v99_v31 = vadd.f32 %v97_v30, %v85_v29 }
  0x9c   :  { %100 = vst [vmem:[#allocation7] sm:$0xff] %v99_v31 }
  0x9d   :  { %111 = dma.vmem_to_hbm [thread:$0]  %s107_s26, 128, %s109_s29, [#allocation4]  }
  0x9e   :  { %194 = dma.done.wait [#allocation4], 128  }
  0x9f   :  { %195 = vsyncadd [#allocation4], 4294967168 }
  0xa0   :  { %116 = vsyncpa [#allocation3], 1 }
  0xa1   :  { %117 = vsyncpa [#allocation4], 1 }
  0xa2   :  { %118 = vsyncpa [#allocation5], 1 }

</bundles_post_ra>
